<compile_context>
chip_gen: v7x
topology: tpu7x:2x2x1
jax: 0.10.0
libtpu: 0.0.40
codegen_flags: <defaults>
</compile_context>

<pallas_src>
import functools

import numpy as np
import jax
import jax.numpy as jnp
from jax.experimental import pallas as pl
from jax.experimental.pallas import tpu as pltpu


# ---------------------------------------------------------------------------
# Layer kernel: all three (N, N) Lambda tiles per grid step.
# Grid = (Nm//tm, Nn//tn), both axes parallel (pure map, no reduction).
# ---------------------------------------------------------------------------
def _piham_layers_kernel(t_ref, vt_ref, lam_bern_ref, lam_pois_ref, lam_gaus_ref):
    vt = vt_ref[...]                                                  # (K, tn) lane-dense RHS

    m0 = jnp.dot(t_ref[0], vt, preferred_element_type=jnp.float32)   # (tm, tn)
    lam_bern_ref[...] = jax.nn.sigmoid(m0).astype(lam_bern_ref.dtype)      # Bernoulli layer

    m1 = jnp.dot(t_ref[1], vt, preferred_element_type=jnp.float32)
    lam_pois_ref[...] = jnp.exp(m1).astype(lam_pois_ref.dtype)              # Poisson layer

    m2 = jnp.dot(t_ref[2], vt, preferred_element_type=jnp.float32)
    lam_gaus_ref[...] = m2.astype(lam_gaus_ref.dtype)                       # Gaussian layer (identity)


# ---------------------------------------------------------------------------
# Covariate kernel (tiny): pi_categorical / pi_poisson / pi_gaussian.
# Hoisted out of the hot store-bound kernel; single matmul against concatenated H.
# ---------------------------------------------------------------------------
def _piham_cov_kernel(u_ref, v_ref, hall_ref, pic_ref, pip_ref, pig_ref, *, Z, Pp, Pg):
    uv = (u_ref[...] + v_ref[...]) * 0.5                                       # (tm, K)
    s = jnp.dot(uv, hall_ref[...], preferred_element_type=jnp.float32)         # (tm, Z+Pp+Pg)

    # categorical: row-softmax over the first Z lanes
    sc = s[:, :Z]
    sc = sc - jnp.max(sc, axis=-1, keepdims=True)
    e = jnp.exp(sc)
    pic_ref[...] = e / jnp.sum(e, axis=-1, keepdims=True)

    # Poisson covariates: exp link
    pip_ref[...] = jnp.exp(s[:, Z:Z + Pp])

    # Gaussian covariates: identity link
    pig_ref[...] = s[:, Z + Pp:Z + Pp + Pg]


def _round_up(x, m):
    return ((x + m - 1) // m) * m


def _choose_tile(n, target, align):
    """Full dim if it fits under target (valid block shape), else an aligned tile."""
    if n <= target:
        return n
    return max((target // align) * align, align)


def piham_forward(U, V, W, Hcat, Hpoi, Hgau, *,
                  tile_m=512, tile_n=2048, lambda_dtype=jnp.float32):
    """Mirrors PIHAM.forward(): returns the six expected-value tensors."""
    N, K = U.shape
    L = W.shape[0]
    Z = Hcat.shape[1]
    Pp = Hpoi.shape[1]
    Pg = Hgau.shape[1]

    # ---- hoisted (tiny) precompute --------------------------------------------------
    # First matmul of every layer, U @ W_l, done once in XLA (3*N*K*K flops).
    T = jnp.einsum('ik,lkq->liq', U, W).astype(jnp.float32)          # (L, N, K)
    # Pre-transposed V so the in-kernel MXU RHS is lane-dense.
    Vt = jnp.transpose(V).astype(jnp.float32)                         # (K, N)
    # One combined community-covariate operand -> one MXU pass in the covariate kernel.
    Hall = jnp.concatenate([Hcat, Hpoi, Hgau], axis=1).astype(jnp.float32)  # (K, Z+Pp+Pg)

    # ---- main layer kernel: tiled (N, N) outputs -------------------------------------
    tm = _choose_tile(N, tile_m, 8)
    tn = _choose_tile(N, tile_n, 128)
    Nm = _round_up(N, tm)
    Nn = _round_up(N, tn)
    if Nm != N:
        T = jnp.pad(T, ((0, 0), (0, Nm - N), (0, 0)))
    if Nn != N:
        Vt = jnp.pad(Vt, ((0, 0), (0, Nn - N)))
    grid = (Nm // tm, Nn // tn)

    lam_b, lam_p, lam_g = pl.pallas_call(
        _piham_layers_kernel,
        out_shape=(
            jax.ShapeDtypeStruct((1, Nm, Nn), lambda_dtype),   # Lambda_bernoulli
            jax.ShapeDtypeStruct((1, Nm, Nn), lambda_dtype),   # Lambda_poisson
            jax.ShapeDtypeStruct((1, Nm, Nn), lambda_dtype),   # Lambda_gaussian
        ),
        grid_spec=pltpu.PrefetchScalarGridSpec(
            num_scalar_prefetch=0,
            grid=grid,
            in_specs=[
                pl.BlockSpec((L, tm, K), lambda i, j: (0, i, 0)),   # T row tiles (all layers)
                pl.BlockSpec((K, tn), lambda i, j: (0, j)),         # V^T column tile (lane-dense)
            ],
            out_specs=[
                pl.BlockSpec((pl.Squeezed(), tm, tn), lambda i, j: (0, i, j)),
                pl.BlockSpec((pl.Squeezed(), tm, tn), lambda i, j: (0, i, j)),
                pl.BlockSpec((pl.Squeezed(), tm, tn), lambda i, j: (0, i, j)),
            ],
        ),
        compiler_params=pltpu.CompilerParams(
            # Pure map over output tiles -> both axes shard across TensorCores (v7x).
            dimension_semantics=("parallel", "parallel"),
            # Sized for v7x's 64 MiB physical VMEM; also valid on v5e/v6e.
            vmem_limit_bytes=48 * 1024 * 1024,
        ),
    )(T, Vt)

    if Nm != N or Nn != N:
        lam_b = lam_b[:, :N, :N]
        lam_p = lam_p[:, :N, :N]
        lam_g = lam_g[:, :N, :N]

    # ---- covariate kernel (tiny, separate call) ---------------------------------------
    tmc = _choose_tile(N, 512, 8)
    Nc = _round_up(N, tmc)
    Uc = U if Nc == N else jnp.pad(U, ((0, Nc - N), (0, 0)))
    Vc = V if Nc == N else jnp.pad(V, ((0, Nc - N), (0, 0)))

    cov_kernel = functools.partial(_piham_cov_kernel, Z=Z, Pp=Pp, Pg=Pg)
    pic, pip, pig = pl.pallas_call(
        cov_kernel,
        out_shape=(
            jax.ShapeDtypeStruct((Nc, Z), jnp.float32),    # pi_categorical
            jax.ShapeDtypeStruct((Nc, Pp), jnp.float32),   # pi_poisson
            jax.ShapeDtypeStruct((Nc, Pg), jnp.float32),   # pi_gaussian
        ),
        grid_spec=pltpu.PrefetchScalarGridSpec(
            num_scalar_prefetch=0,
            grid=(Nc // tmc,),
            in_specs=[
                pl.BlockSpec((tmc, K), lambda i: (i, 0)),
                pl.BlockSpec((tmc, K), lambda i: (i, 0)),
                pl.BlockSpec((K, Z + Pp + Pg), lambda i: (0, 0)),
            ],
            out_specs=[
                pl.BlockSpec((tmc, Z), lambda i: (i, 0)),
                pl.BlockSpec((tmc, Pp), lambda i: (i, 0)),
                pl.BlockSpec((tmc, Pg), lambda i: (i, 0)),
            ],
        ),
        compiler_params=pltpu.CompilerParams(
            dimension_semantics=("parallel",),
        ),
    )(Uc, Vc, Hall)

    if Nc != N:
        pic = pic[:N]
        pip = pip[:N]
        pig = pig[:N]

    return lam_b, lam_p, lam_g, pic, pip, pig


def piham_forward_reference(U, V, W, Hcat, Hpoi, Hgau):
    """Plain-JAX reference for correctness checking."""
    M = jnp.einsum('ik,lkq,jq->lij', U, W, V)
    lam_b = jax.nn.sigmoid(M[0:1])
    lam_p = jnp.exp(M[1:2])
    lam_g = M[2:3]
    uv = (U + V) * 0.5
    pic = jax.nn.softmax(uv @ Hcat, axis=-1)
    pip = jnp.exp(uv @ Hpoi)
    pig = uv @ Hgau
    return lam_b, lam_p, lam_g, pic, pip, pig


if __name__ == "__main__":
    # Small problem sizes consistent with the module's docstring / __init__
    N, K, L = 32, 8, 3
    Z_categorical, P_poisson, P_gaussian = 4, 2, 3

    key = jax.random.PRNGKey(0)
    kU, kV, kW, kHc, kHp, kHg = jax.random.split(key, 6)

    # Deterministic synthetic latent variables (what self.initialize() would produce)
    U = 0.1 * jax.random.normal(kU, (N, K), dtype=jnp.float32)
    V = 0.1 * jax.random.normal(kV, (N, K), dtype=jnp.float32)
    W = 0.1 * jax.random.normal(kW, (L, K, K), dtype=jnp.float32)
    Hcat = 0.1 * jax.random.normal(kHc, (K, Z_categorical), dtype=jnp.float32)
    Hpoi = 0.1 * jax.random.normal(kHp, (K, P_poisson), dtype=jnp.float32)
    Hgau = 0.1 * jax.random.normal(kHg, (K, P_gaussian), dtype=jnp.float32)

    outs = jax.jit(piham_forward)(U, V, W, Hcat, Hpoi, Hgau)
    outs = jax.block_until_ready(outs)

    refs = piham_forward_reference(U, V, W, Hcat, Hpoi, Hgau)
    for o, r in zip(outs, refs):
        assert o.shape == r.shape and o.dtype == r.dtype, (o.shape, r.shape, o.dtype, r.dtype)
        np.testing.assert_allclose(np.asarray(o), np.asarray(r), rtol=1e-5, atol=1e-5)

    print("KERNEL_OK")
</pallas_src>

<mosaic_0001>
module attributes {stable_mosaic.version = 11 : i64} {
  func.func @_piham_layers_kernel(%arg0: i32, %arg1: i32, %arg2: memref<3x32x8xf32, #tpu.memory_space<vmem>>, %arg3: memref<8x32xf32, #tpu.memory_space<vmem>>, %arg4: memref<1x32x32xf32, #tpu.memory_space<vmem>>, %arg5: memref<1x32x32xf32, #tpu.memory_space<vmem>>, %arg6: memref<1x32x32xf32, #tpu.memory_space<vmem>>) attributes {dimension_semantics = [#tpu.dimension_semantics<parallel>, #tpu.dimension_semantics<parallel>], iteration_bounds = array<i64: 1, 1>, scalar_prefetch = 0 : i64, scratch_operands = 0 : i64, tpu.core_type = #tpu.core_type<tc>, window_params = [{transform_indices = @transform_0, window_bounds = array<i64: 3, 32, 8>}, {transform_indices = @transform_1, window_bounds = array<i64: 8, 32>}, {transform_indices = @transform_2, window_bounds = array<i64: 1, 32, 32>}, {transform_indices = @transform_3, window_bounds = array<i64: 1, 32, 32>}, {transform_indices = @transform_4, window_bounds = array<i64: 1, 32, 32>}]} {
    %c0 = arith.constant 0 : index
    %c0_0 = arith.constant 0 : index
    %0 = vector.load %arg3[%c0, %c0_0] : memref<8x32xf32, #tpu.memory_space<vmem>>, vector<8x32xf32>
    %c0_1 = arith.constant 0 : index
    %c0_2 = arith.constant 0 : index
    %c0_3 = arith.constant 0 : index
    %1 = vector.load %arg2[%c0_1, %c0_2, %c0_3] : memref<3x32x8xf32, #tpu.memory_space<vmem>>, vector<1x32x8xf32>
    %2 = vector.shape_cast %1 : vector<1x32x8xf32> to vector<32x8xf32>
    %cst = arith.constant dense<0.000000e+00> : vector<32x32xf32>
    %3 = tpu.matmul %2, %0, %cst {dimension_numbers = #tpu.dot_dimension_numbers<[1], [0], [0], [1], [0, 0, 1, 1], [], []>} : vector<32x8xf32>, vector<8x32xf32>, vector<32x32xf32> -> vector<32x32xf32>
    %4 = arith.negf %3 : vector<32x32xf32>
    %5 = math.exp %4 : vector<32x32xf32>
    %cst_4 = arith.constant 1.000000e+00 : f32
    %6 = vector.broadcast %cst_4 : f32 to vector<32x32xf32>
    %7 = arith.addf %6, %5 : vector<32x32xf32>
    %8 = arith.divf %6, %7 : vector<32x32xf32>
    %c0_5 = arith.constant 0 : index
    %c0_6 = arith.constant 0 : index
    %c0_7 = arith.constant 0 : index
    %9 = vector.load %arg4[%c0_5, %c0_6, %c0_7] : memref<1x32x32xf32, #tpu.memory_space<vmem>>, vector<1x32x32xf32>
    %10 = vector.shape_cast %9 : vector<1x32x32xf32> to vector<32x32xf32>
    %11 = vector.shape_cast %8 : vector<32x32xf32> to vector<1x32x32xf32>
    tpu.vector_store %arg4[%c0_5, %c0_6, %c0_7], %11 {strides = array<i32>} : memref<1x32x32xf32, #tpu.memory_space<vmem>>, vector<1x32x32xf32>,
    %c1 = arith.constant 1 : index
    %c0_8 = arith.constant 0 : index
    %c0_9 = arith.constant 0 : index
    %12 = vector.load %arg2[%c1, %c0_8, %c0_9] : memref<3x32x8xf32, #tpu.memory_space<vmem>>, vector<1x32x8xf32>
    %13 = vector.shape_cast %12 : vector<1x32x8xf32> to vector<32x8xf32>
    %cst_10 = arith.constant dense<0.000000e+00> : vector<32x32xf32>
    %14 = tpu.matmul %13, %0, %cst_10 {dimension_numbers = #tpu.dot_dimension_numbers<[1], [0], [0], [1], [0, 0, 1, 1], [], []>} : vector<32x8xf32>, vector<8x32xf32>, vector<32x32xf32> -> vector<32x32xf32>
    %15 = math.exp %14 : vector<32x32xf32>
    %c0_11 = arith.constant 0 : index
    %c0_12 = arith.constant 0 : index
    %c0_13 = arith.constant 0 : index
    %16 = vector.load %arg5[%c0_11, %c0_12, %c0_13] : memref<1x32x32xf32, #tpu.memory_space<vmem>>, vector<1x32x32xf32>
    %17 = vector.shape_cast %16 : vector<1x32x32xf32> to vector<32x32xf32>
    %18 = vector.shape_cast %15 : vector<32x32xf32> to vector<1x32x32xf32>
    tpu.vector_store %arg5[%c0_11, %c0_12, %c0_13], %18 {strides = array<i32>} : memref<1x32x32xf32, #tpu.memory_space<vmem>>, vector<1x32x32xf32>,
    %c2 = arith.constant 2 : index
    %c0_14 = arith.constant 0 : index
    %c0_15 = arith.constant 0 : index
    %19 = vector.load %arg2[%c2, %c0_14, %c0_15] : memref<3x32x8xf32, #tpu.memory_space<vmem>>, vector<1x32x8xf32>
    %20 = vector.shape_cast %19 : vector<1x32x8xf32> to vector<32x8xf32>
    %cst_16 = arith.constant dense<0.000000e+00> : vector<32x32xf32>
    %21 = tpu.matmul %20, %0, %cst_16 {dimension_numbers = #tpu.dot_dimension_numbers<[1], [0], [0], [1], [0, 0, 1, 1], [], []>} : vector<32x8xf32>, vector<8x32xf32>, vector<32x32xf32> -> vector<32x32xf32>
    %c0_17 = arith.constant 0 : index
    %c0_18 = arith.constant 0 : index
    %c0_19 = arith.constant 0 : index
    %22 = vector.load %arg6[%c0_17, %c0_18, %c0_19] : memref<1x32x32xf32, #tpu.memory_space<vmem>>, vector<1x32x32xf32>
    %23 = vector.shape_cast %22 : vector<1x32x32xf32> to vector<32x32xf32>
    %24 = vector.shape_cast %21 : vector<32x32xf32> to vector<1x32x32xf32>
    tpu.vector_store %arg6[%c0_17, %c0_18, %c0_19], %24 {strides = array<i32>} : memref<1x32x32xf32, #tpu.memory_space<vmem>>, vector<1x32x32xf32>,
    return
  }
  func.func @transform_0(%arg0: i32, %arg1: i32) -> (i32, i32, i32) {
    %c0_i32 = arith.constant 0 : i32
    %c0_i32_0 = arith.constant 0 : i32
    %c0_i32_1 = arith.constant 0 : i32
    return %c0_i32, %arg0, %c0_i32_0 : i32, i32, i32
  }
  func.func @transform_1(%arg0: i32, %arg1: i32) -> (i32, i32) {
    %c0_i32 = arith.constant 0 : i32
    %c0_i32_0 = arith.constant 0 : i32
    return %c0_i32, %arg1 : i32, i32
  }
  func.func @transform_2(%arg0: i32, %arg1: i32) -> (i32, i32, i32) {
    %c0_i32 = arith.constant 0 : i32
    %c0_i32_0 = arith.constant 0 : i32
    return %c0_i32, %arg0, %arg1 : i32, i32, i32
  }
  func.func @transform_3(%arg0: i32, %arg1: i32) -> (i32, i32, i32) {
    %c0_i32 = arith.constant 0 : i32
    %c0_i32_0 = arith.constant 0 : i32
    return %c0_i32, %arg0, %arg1 : i32, i32, i32
  }
  func.func @transform_4(%arg0: i32, %arg1: i32) -> (i32, i32, i32) {
    %c0_i32 = arith.constant 0 : i32
    %c0_i32_0 = arith.constant 0 : i32
    return %c0_i32, %arg0, %arg1 : i32, i32, i32
  }
}

module attributes {stable_mosaic.version = 11 : i64} {
  func.func @_piham_cov_kernel(%arg0: i32, %arg1: memref<32x8xf32, #tpu.memory_space<vmem>>, %arg2: memref<32x8xf32, #tpu.memory_space<vmem>>, %arg3: memref<8x9xf32, #tpu.memory_space<vmem>>, %arg4: memref<32x4xf32, #tpu.memory_space<vmem>>, %arg5: memref<32x2xf32, #tpu.memory_space<vmem>>, %arg6: memref<32x3xf32, #tpu.memory_space<vmem>>) attributes {dimension_semantics = [#tpu.dimension_semantics<parallel>], iteration_bounds = array<i64: 1>, scalar_prefetch = 0 : i64, scratch_operands = 0 : i64, tpu.core_type = #tpu.core_type<tc>, window_params = [{transform_indices = @transform_0, window_bounds = array<i64: 32, 8>}, {transform_indices = @transform_1, window_bounds = array<i64: 32, 8>}, {pipeline_mode = #tpu.pipeline_mode<synchronous>, transform_indices = @transform_2, window_bounds = array<i64: 8, 9>}, {transform_indices = @transform_3, window_bounds = array<i64: 32, 4>}, {transform_indices = @transform_4, window_bounds = array<i64: 32, 2>}, {transform_indices = @transform_5, window_bounds = array<i64: 32, 3>}]} {
    %c0 = arith.constant 0 : index
    %c0_0 = arith.constant 0 : index
    %0 = vector.load %arg1[%c0, %c0_0] : memref<32x8xf32, #tpu.memory_space<vmem>>, vector<32x8xf32>
    %c0_1 = arith.constant 0 : index
    %c0_2 = arith.constant 0 : index
    %1 = vector.load %arg2[%c0_1, %c0_2] : memref<32x8xf32, #tpu.memory_space<vmem>>, vector<32x8xf32>
    %2 = arith.addf %0, %1 : vector<32x8xf32>
    %cst = arith.constant 5.000000e-01 : f32
    %3 = vector.broadcast %cst : f32 to vector<32x8xf32>
    %4 = arith.mulf %2, %3 : vector<32x8xf32>
    %c0_3 = arith.constant 0 : index
    %c0_4 = arith.constant 0 : index
    %5 = vector.load %arg3[%c0_3, %c0_4] : memref<8x9xf32, #tpu.memory_space<vmem>>, vector<8x9xf32>
    %cst_5 = arith.constant dense<0.000000e+00> : vector<32x9xf32>
    %6 = tpu.matmul %4, %5, %cst_5 {dimension_numbers = #tpu.dot_dimension_numbers<[1], [0], [0], [1], [0, 0, 1, 1], [], []>} : vector<32x8xf32>, vector<8x9xf32>, vector<32x9xf32> -> vector<32x9xf32>
    %7 = vector.extract_strided_slice %6 {offsets = [0, 0], sizes = [32, 4], strides = [1, 1]} : vector<32x9xf32> to vector<32x4xf32>
    %cst_6 = arith.constant dense<0xFF800000> : vector<32xf32>
    %8 = vector.multi_reduction <maximumf>, %7, %cst_6 [1] : vector<32x4xf32> to vector<32xf32>
    %9 = vector.shape_cast %8 : vector<32xf32> to vector<32x1xf32>
    %10 = vector.broadcast %9 : vector<32x1xf32> to vector<32x4xf32>
    %11 = arith.subf %7, %10 : vector<32x4xf32>
    %12 = math.exp %11 : vector<32x4xf32>
    %cst_7 = arith.constant dense<0.000000e+00> : vector<32xf32>
    %13 = vector.multi_reduction <add>, %12, %cst_7 [1] : vector<32x4xf32> to vector<32xf32>
    %14 = vector.shape_cast %13 : vector<32xf32> to vector<32x1xf32>
    %15 = vector.broadcast %14 : vector<32x1xf32> to vector<32x4xf32>
    %16 = arith.divf %12, %15 : vector<32x4xf32>
    %c0_8 = arith.constant 0 : index
    %c0_9 = arith.constant 0 : index
    %17 = vector.load %arg4[%c0_8, %c0_9] : memref<32x4xf32, #tpu.memory_space<vmem>>, vector<32x4xf32>
    tpu.vector_store %arg4[%c0_8, %c0_9], %16 {strides = array<i32>} : memref<32x4xf32, #tpu.memory_space<vmem>>, vector<32x4xf32>,
    %18 = vector.extract_strided_slice %6 {offsets = [0, 4], sizes = [32, 2], strides = [1, 1]} : vector<32x9xf32> to vector<32x2xf32>
    %19 = math.exp %18 : vector<32x2xf32>
    %c0_10 = arith.constant 0 : index
    %c0_11 = arith.constant 0 : index
    %20 = vector.load %arg5[%c0_10, %c0_11] : memref<32x2xf32, #tpu.memory_space<vmem>>, vector<32x2xf32>
    tpu.vector_store %arg5[%c0_10, %c0_11], %19 {strides = array<i32>} : memref<32x2xf32, #tpu.memory_space<vmem>>, vector<32x2xf32>,
    %21 = vector.extract_strided_slice %6 {offsets = [0, 6], sizes = [32, 3], strides = [1, 1]} : vector<32x9xf32> to vector<32x3xf32>
    %c0_12 = arith.constant 0 : index
    %c0_13 = arith.constant 0 : index
    %22 = vector.load %arg6[%c0_12, %c0_13] : memref<32x3xf32, #tpu.memory_space<vmem>>, vector<32x3xf32>
    tpu.vector_store %arg6[%c0_12, %c0_13], %21 {strides = array<i32>} : memref<32x3xf32, #tpu.memory_space<vmem>>, vector<32x3xf32>,
    return
  }
  func.func @transform_0(%arg0: i32) -> (i32, i32) {
    %c0_i32 = arith.constant 0 : i32
    %c0_i32_0 = arith.constant 0 : i32
    return %arg0, %c0_i32 : i32, i32
  }
  func.func @transform_1(%arg0: i32) -> (i32, i32) {
    %c0_i32 = arith.constant 0 : i32
    %c0_i32_0 = arith.constant 0 : i32
    return %arg0, %c0_i32 : i32, i32
  }
  func.func @transform_2(%arg0: i32) -> (i32, i32) {
    %c0_i32 = arith.constant 0 : i32
    %c0_i32_0 = arith.constant 0 : i32
    %c0_i32_1 = arith.constant 0 : i32
    return %c0_i32, %c0_i32_0 : i32, i32
  }
  func.func @transform_3(%arg0: i32) -> (i32, i32) {
    %c0_i32 = arith.constant 0 : i32
    %c0_i32_0 = arith.constant 0 : i32
    return %arg0, %c0_i32 : i32, i32
  }
  func.func @transform_4(%arg0: i32) -> (i32, i32) {
    %c0_i32 = arith.constant 0 : i32
    %c0_i32_0 = arith.constant 0 : i32
    return %arg0, %c0_i32 : i32, i32
  }
  func.func @transform_5(%arg0: i32) -> (i32, i32) {
    %c0_i32 = arith.constant 0 : i32
    %c0_i32_0 = arith.constant 0 : i32
    return %arg0, %c0_i32 : i32, i32
  }
}

</mosaic_0001>

<bundles_post_ra>
// kernel: piham_forward.3
= control target key start
LH: loop header
LB: loop body
LE: loop exit
PB: predicated region body
PF: predicated region fallthrough
CT: control target
= control target key end

     0   :  { %vm34_vm0 = vcmask 64512   ;;  %vm132_vm1 = vcmask 31744   ;;  %vm226_vm2 = vcmask 23552   ;;  %vm205_vm3 = vcmask 15360   ;;  %s415_s2 = inlined_call_operand.vmem [shape: f32[8,9], index: 2, kind: input, shape index: {}]   ;;  %s416_s0 = inlined_call_operand.vmem [shape: f32[32,8], index: 0, kind: input, shape index: {}]   ;;  %s417_s1 = inlined_call_operand.vmem [shape: f32[32,8], index: 1, kind: input, shape index: {}]   ;;  %s418_s5 = inlined_call_operand.vmem [shape: f32[32,3], index: 5, kind: output, shape index: {2}]   ;;  %s419_s4 = inlined_call_operand.vmem [shape: f32[32,2], index: 4, kind: output, shape index: {1}]   ;;  %s420_s3 = inlined_call_operand.vmem [shape: f32[32,4], index: 3, kind: output, shape index: {0}]  }
   0x1   :  { %v33_v0 = vld [vmem:[%s415_s2] sm:$0xff]  ;;  %v19_v4 = vld [vmem:[%s416_s0 + $0x10] sm:$0xff]  ;;  %v18_v6 = vld [vmem:[%s416_s0 + $0x8] sm:$0xff] }
   0x2   :  { %v17_v1 = vld [vmem:[%s416_s0] sm:$0xff]  ;;  %252 = vmatprep.subr.mxu0 %v33_v0  ;;  %260 = vmatprep.subr.mxu1 %v33_v0  ;;  %v23_v5 = vld [vmem:[%s417_s1 + $0x10] sm:$0xff]  ;;  %v22_v8 = vld [vmem:[%s417_s1 + $0x8] sm:$0xff] }
   0x3   :  { %v21_v2 = vld [vmem:[%s417_s1] sm:$0xff]  ;;  %253 = vmatpush3.msra.mxu0 %v33_v0  ;;  %261 = vmatpush3.msra.mxu1 %v33_v0  ;;  %v27_v7 = vadd.f32 %v23_v5, %v19_v4  ;;  %v20_v9 = vld [vmem:[%s416_s0 + $0x18] sm:$0xff]  ;;  %v26_v12 = vadd.f32 %v22_v8, %v18_v6  ;;  %s288_s0 = smov 122  }
   0x4   :  { %v25_v3 = vadd.f32 %v21_v2, %v17_v1  ;;  %v24_v10 = vld [vmem:[%s417_s1 + $0x18] sm:$0xff]  ;;  %s289_s1 = smov 124  }
   0x5   :  { %v28_v13 = vadd.f32 %v24_v10, %v20_v9  ;;  %v31_v14 = vmul.f32 0.5, %v27_v7  ;;  %v30_v15 = vmul.f32 0.5, %v26_v12 }
   0x6   :  { %v29_v11 = vmul.f32 0.5, %v25_v3 }
   0x7   :  { %v32_v16 = vmul.f32 0.5, %v28_v13  ;;  %257 = vmatprep.mubr.msk.f32.mxu1 %vm34_vm0, %v31_v14 }
   0x8   :  { %254 = vmatprep.mubr.msk.f32.mxu0 %vm34_vm0, %v29_v11 }
   0x9   :  { %255 = vmatmul.mubr.msk.f32.vlgmr.msra.gmra.mrb[0].mxu0 %vm34_vm0, %v30_v15  ;;  %258 = vmatmul.mubr.msk.f32.vlgmr.msra.gmra.mrb[0].mxu1 %vm34_vm0, %v32_v16 }
  0xdc   :  { %v256_v17 = vpop.f32.mrb[0].mxu0  ;;  %v347_v18 = vpop.f32.mrb[0].mxu1 }
  0xdd   :  { %v113_v19 = vpop.f32.mrb[1].mxu0  ;;  %v349_v20 = vpop.f32.mrb[1].mxu1  ;;  %v142_v23 = vsel %vm132_vm1, %v347_v18, -inf  ;;  %v136_v24 = vsel %vm132_vm1, %v256_v17, -inf  ;;  %v183_v25 = vmul.f32 1.442695, %v256_v17 }
  0xde   :  { %v139_v21 = vsel %vm132_vm1, %v349_v20, -inf  ;;  %v133_v22 = vsel %vm132_vm1, %v113_v19, -inf  ;;  %v187_v26 = vmul.f32 1.442695, %v347_v18  ;;  %v181_v27 = vmul.f32 1.442695, %v113_v19 }
  0xdf   :  { %140 = vmax.xlane.f32.xlu1 %v139_v21  ;;  %134 = vmax.xlane.f32.xlu0 %v133_v22  ;;  %264 = vpow2.f32 %v183_v25  ;;  %v185_v28 = vmul.f32 1.442695, %v349_v20 }
  0xe0   :  { %266 = vpow2.f32 %v187_v26 }
  0xe1   :  { %268 = vpow2.f32 %v181_v27 }
  0xe2   :  { %270 = vpow2.f32 %v185_v28 }
  0xe3   :  { %143 = vmax.xlane.f32.xlu1 %v142_v23  ;;  %137 = vmax.xlane.f32.xlu0 %v136_v24 }
  0xe9   :  { %v265_v29 = vpop.eup %264 }
  0xea   :  { %v267_v30 = vpop.eup %266 }
  0xeb   :  { %v269_v31 = vpop.eup %268 }
  0xec   :  { %v271_v32 = vpop.eup %270 }
  0xf4   :  { %216 = vrot.lane.b32.xlu1 %v256_v17, %s288_s0 }
  0xf8   :  { %195 = vrot.lane.b32.xlu1 %v265_v29, %s289_s1 }
  0xf9   :  { %214 = vrot.lane.b32.xlu0 %v113_v19, %s288_s0 }
  0xfc   :  { %199 = vrot.lane.b32.xlu1 %v267_v30, %s289_s1 }
  0xfd   :  { %193 = vrot.lane.b32.xlu0 %v269_v31, %s289_s1 }
 0x100   :  { %197 = vrot.lane.b32.xlu1 %v271_v32, %s289_s1 }
 0x16c   :  { %v141_v33 = vpop.xlane.xlu1 %140  ;;  %v135_v34 = vpop.xlane.xlu0 %134 }
 0x16d   :  { %v147_v35 = vsub.f32 %v349_v20, %v141_v33  ;;  %v145_v36 = vsub.f32 %v113_v19, %v135_v34 }
 0x16f   :  { %v149_v37 = vmul.f32 1.442695, %v145_v36  ;;  %v153_v38 = vmul.f32 1.442695, %v147_v35 }
 0x170   :  { %v144_v39 = vpop.xlane.xlu1 %143  ;;  %v138_v40 = vpop.xlane.xlu0 %137 }
 0x171   :  { %v148_v41 = vsub.f32 %v347_v18, %v144_v39  ;;  %v146_v42 = vsub.f32 %v256_v17, %v138_v40  ;;  %272 = vpow2.f32 %v149_v37 }
 0x172   :  { %274 = vpow2.f32 %v153_v38 }
 0x173   :  { %v151_v43 = vmul.f32 1.442695, %v146_v42  ;;  %v155_v44 = vmul.f32 1.442695, %v148_v41 }
 0x174   :  { %v217_v45 = vpop.permute.xlu1 %216  ;;  %v215_v46 = vpop.permute.xlu0 %214 }
 0x175   :  { %228 = vst.msk [vmem:[%s418_s5 + $0x8] sm:$0xff] %vm226_vm2, %v217_v45  ;;  %227 = vst.msk [vmem:[%s418_s5] sm:$0xff] %vm226_vm2, %v215_v46  ;;  %276 = vpow2.f32 %v151_v43 }
 0x176   :  { %278 = vpow2.f32 %v155_v44 }
 0x178   :  { %v196_v47 = vpop.permute.xlu1 %195  ;;  %v194_v48 = vpop.permute.xlu0 %193 }
 0x179   :  { %207 = vst.msk [vmem:[%s419_s4 + $0x8] sm:$0xff] %vm205_vm3, %v196_v47  ;;  %206 = vst.msk [vmem:[%s419_s4] sm:$0xff] %vm205_vm3, %v194_v48 }
 0x17b   :  { %v273_v49 = vpop.eup %272 }
 0x17c   :  { %v200_v50 = vpop.permute.xlu1 %199  ;;  %v157_v51 = vsel %vm132_vm1, %v273_v49, 0.0  ;;  %v275_v52 = vpop.eup %274 }
 0x17d   :  { %209 = vst.msk [vmem:[%s419_s4 + $0x18] sm:$0xff] %vm205_vm3, %v200_v50  ;;  %158 = vadd.xlane.f32.xlu0 %v157_v51  ;;  %v163_v55 = vsel %vm132_vm1, %v275_v52, 0.0 }
 0x17f   :  { %v277_v53 = vpop.eup %276 }
 0x180   :  { %v198_v54 = vpop.permute.xlu1 %197  ;;  %v160_v56 = vsel %vm132_vm1, %v277_v53, 0.0  ;;  %v279_v57 = vpop.eup %278 }
 0x181   :  { %208 = vst.msk [vmem:[%s419_s4 + $0x10] sm:$0xff] %vm205_vm3, %v198_v54  ;;  %164 = vadd.xlane.f32.xlu0 %v163_v55  ;;  %161 = vadd.xlane.f32.xlu1 %v160_v56  ;;  %v166_v58 = vsel %vm132_vm1, %v279_v57, 0.0 }
 0x185   :  { %167 = vadd.xlane.f32.xlu1 %v166_v58 }
 0x196   :  { %220 = vrot.lane.b32.xlu1 %v347_v18, %s288_s0 }
 0x197   :  { %218 = vrot.lane.b32.xlu0 %v349_v20, %s288_s0 }
 0x20a   :  { %v159_v59 = vpop.xlane.xlu0 %158 }
 0x20b   :  { %280 = vrcp.f32 %v159_v59 }
 0x20e   :  { %v162_v60 = vpop.xlane.xlu1 %161  ;;  %v165_v61 = vpop.xlane.xlu0 %164 }
 0x20f   :  { %282 = vrcp.f32 %v162_v60 }
 0x210   :  { %284 = vrcp.f32 %v165_v61 }
 0x212   :  { %v168_v62 = vpop.xlane.xlu1 %167  ;;  %v219_v63 = vpop.permute.xlu0 %218 }
 0x213   :  { %286 = vrcp.f32 %v168_v62  ;;  %229 = vst.msk [vmem:[%s418_s5 + $0x10] sm:$0xff] %vm226_vm2, %v219_v63 }
 0x215   :  { %v281_v0 = vpop.eup %280 }
 0x216   :  { %v170_v1 = vmul.f32 %v281_v0, %v273_v49  ;;  %v221_v2 = vpop.permute.xlu1 %220 }
 0x217   :  { %230 = vst.msk [vmem:[%s418_s5 + $0x18] sm:$0xff] %vm226_vm2, %v221_v2 }
 0x218   :  { %177 = vst.msk [vmem:[%s420_s3] sm:$0xff] %vm132_vm1, %v170_v1 }
 0x219   :  { %v283_v3 = vpop.eup %282 }
 0x21a   :  { %v285_v4 = vpop.eup %284  ;;  %v172_v5 = vmul.f32 %v283_v3, %v277_v53 }
 0x21b   :  { %v174_v6 = vmul.f32 %v285_v4, %v275_v52 }
 0x21c   :  { %178 = vst.msk [vmem:[%s420_s3 + $0x8] sm:$0xff] %vm132_vm1, %v172_v5 }
 0x21d   :  { %v287_v7 = vpop.eup %286  ;;  %179 = vst.msk [vmem:[%s420_s3 + $0x10] sm:$0xff] %vm132_vm1, %v174_v6 }
 0x21e   :  { %v176_v8 = vmul.f32 %v287_v7, %v279_v57 }
 0x220   :  { %180 = vst.msk [vmem:[%s420_s3 + $0x18] sm:$0xff] %vm132_vm1, %v176_v8 }

// kernel: piham_forward.2
= control target key start
LH: loop header
LB: loop body
LE: loop exit
PB: predicated region body
PF: predicated region fallthrough
CT: control target
= control target key end

     0   :  { %10 = vsyncpa [#allocation3], 0  ;;  %vm21_vm0 = vcmask 64512   ;;  %s727_s0 = inlined_call_operand.vmem [shape: f32[3,32,8], index: 0, kind: input, shape index: {}]   ;;  %s728_s1 = inlined_call_operand.vmem [shape: f32[8,32], index: 1, kind: input, shape index: {}]   ;;  %s729_s2 = inlined_call_operand.hbm [shape: f32[1,32,32], index: 2, kind: output, shape index: {0}]   ;;  %s730_s3 = inlined_call_operand.hbm [shape: f32[1,32,32], index: 3, kind: output, shape index: {1}]   ;;  %s731_s4 = inlined_call_operand.hbm [shape: f32[1,32,32], index: 4, kind: output, shape index: {2}]  }
   0x1   :  { %v16_v0 = vld [vmem:[%s728_s1] sm:$0xff]  ;;  %v19_v2 = vld [vmem:[%s727_s0 + $0x10] sm:$0xff]  ;;  %v18_v3 = vld [vmem:[%s727_s0 + $0x8] sm:$0xff] }
   0x2   :  { %v17_v1 = vld [vmem:[%s727_s0] sm:$0xff]  ;;  %454 = vmatprep.subr.mxu0 %v16_v0  ;;  %478 = vmatprep.subr.mxu1 %v16_v0  ;;  %v20_v4 = vld [vmem:[%s727_s0 + $0x18] sm:$0xff] }
   0x3   :  { %455 = vmatpush3.msra.mxu0 %v16_v0  ;;  %479 = vmatpush3.msra.mxu1 %v16_v0  ;;  %v423_v5 = vld [vmem:[%s727_s0 + $0x20] sm:$0xff] }
   0x4   :  { %456 = vmatprep.mubr.msk.f32.mxu0 %vm21_vm0, %v17_v1  ;;  %459 = vmatprep.mubr.msk.f32.mxu1 %vm21_vm0, %v19_v2  ;;  %v431_v6 = vld [vmem:[%s727_s0 + $0x40] sm:$0xff] }
   0x5   :  { %457 = vmatmul.mubr.msk.f32.vlgmr.msra.gmra.mrb[0].mxu0 %vm21_vm0, %v18_v3  ;;  %460 = vmatmul.mubr.msk.f32.vlgmr.msra.gmra.mrb[0].mxu1 %vm21_vm0, %v20_v4 }
   0x6   :  { %11 = vsyncpa [#allocation5], 0  ;;  %462 = vmatprep.subr.mxu1 %v16_v0  ;;  %464 = vmatprep.mubr.msk.f32.mxu1 %vm21_vm0, %v423_v5  ;;  %v424_v7 = vld [vmem:[%s727_s0 + $0x28] sm:$0xff]  ;;  %v425_v9 = vld [vmem:[%s727_s0 + $0x30] sm:$0xff]  ;;  %vm143_vm1 = vcmask 261120   ;;  %s580_s15 = smov [#allocation6]  }
   0x7   :  { %v432_v8 = vld [vmem:[%s727_s0 + $0x48] sm:$0xff]  ;;  %463 = vmatpush3.msra.mxu1 %v16_v0  ;;  %470 = vmatprep.subr.mxu0 %v16_v0  ;;  %v433_v10 = vld [vmem:[%s727_s0 + $0x50] sm:$0xff]  ;;  %v426_v11 = vld [vmem:[%s727_s0 + $0x38] sm:$0xff]  ;;  %s397_s16 = sshll.u32 %s580_s15, 4  ;;  %s581_s17 = smov [#allocation2]   ;;  %s667_s16 = int_to_ptr.vmem [resolvable:$true] %s397_s16 }
   0x8   :  { %471 = vmatpush3.msra.mxu0 %v16_v0  ;;  %472 = vmatprep.mubr.msk.f32.mxu0 %vm21_vm0, %v431_v6  ;;  %v434_v12 = vld [vmem:[%s727_s0 + $0x58] sm:$0xff]  ;;  %s579_s0 = smov [#allocation4]   ;;  %s670_s18 = sshll.u32 %s581_s17, 4  ;;  %s374_s18 = int_to_ptr.vmem [resolvable:$true] %s670_s18 }
   0x9   :  { %465 = vmatmul.mubr.msk.f32.vlgmr.msra.gmra.mrb[2].mxu1 %vm21_vm0, %v424_v7  ;;  %473 = vmatmul.mubr.msk.f32.vlgmr.msra.gmra.mrb[2].mxu0 %vm21_vm0, %v432_v8  ;;  %s385_s14 = sshll.u32 %s579_s0, 4  ;;  %s386_s14 = int_to_ptr.vmem [resolvable:$true] %s385_s14 }
   0xa   :  { %467 = vmatprep.mubr.msk.f32.mxu1 %vm21_vm0, %v425_v9  ;;  %475 = vmatprep.mubr.msk.f32.mxu0 %vm21_vm0, %v433_v10  ;;  %s509_s19 = scalar_lea.vmem %s386_s14, 512  ;;  %p514_p1 = scmp.lt.s32.totalorder %s386_s14, %s386_s14 }
   0xb   :  { %p510_p0 = scmp.ne.s32.totalorder %s386_s14, %s509_s19  ;;  %p515_p2 = scmp.lt.s32.totalorder %s509_s19, %s509_s19 }
   0xd   :  { %468 = vmatmul.mubr.msk.f32.gmra.mrb[4].mxu1 %vm21_vm0, %v426_v11  ;;  %476 = vmatmul.mubr.msk.f32.gmra.mrb[4].mxu0 %vm21_vm0, %v434_v12  ;;  %p516_p3 = por %p515_p2, %p514_p1 }
   0xf   :  { %p517_p4 = pnand %p516_p3, %p510_p0 }
  0xd8   :  { %v458_v13 = vpop.f32.mrb[0].mxu0  ;;  %v461_v14 = vpop.f32.mrb[0].mxu1 }
  0xd9   :  { %v420_v15 = vmul.f32 -1.442695, %v458_v13  ;;  %v422_v16 = vmul.f32 -1.442695, %v461_v14  ;;  %v100_v17 = vpop.f32.mrb[1].mxu0  ;;  %v110_v18 = vpop.f32.mrb[1].mxu1 }
  0xda   :  { %v419_v19 = vmul.f32 -1.442695, %v100_v17  ;;  %v421_v20 = vmul.f32 -1.442695, %v110_v18 }
  0xdb   :  { %485 = vpow2.f32 %v420_v15 }
  0xdc   :  { %487 = vpow2.f32 %v422_v16  ;;  %v466_v21 = vpop.f32.mrb[2].mxu1  ;;  %v474_v22 = vpop.f32.mrb[2].mxu0 }
  0xdd   :  { %489 = vpow2.f32 %v419_v19  ;;  %v252_v23 = vmul.f32 1.442695, %v466_v21  ;;  %v231_v24 = vpop.f32.mrb[3].mxu1  ;;  %365 = vst.msk [vmem:[#allocation6 + $0x8] sm:$0xff] %vm143_vm1, %v474_v22  ;;  %v345_v25 = vpop.f32.mrb[3].mxu0 }
  0xde   :  { %491 = vpow2.f32 %v421_v20  ;;  %v250_v26 = vmul.f32 1.442695, %v231_v24  ;;  %364 = vst.msk [vmem:[#allocation6] sm:$0xff] %vm143_vm1, %v345_v25 }
  0xdf   :  { %493 = vpow2.f32 %v252_v23 }
  0xe0   :  { %495 = vpow2.f32 %v250_v26  ;;  %v469_v27 = vpop.f32.mrb[4].mxu1  ;;  %v477_v28 = vpop.f32.mrb[4].mxu0 }
  0xe1   :  { %v256_v29 = vmul.f32 1.442695, %v469_v27  ;;  %v241_v30 = vpop.f32.mrb[5].mxu1  ;;  %367 = vst.msk [vmem:[#allocation6 + $0x18] sm:$0xff] %vm143_vm1, %v477_v28  ;;  %v355_v31 = vpop.f32.mrb[5].mxu0 }
  0xe2   :  { %v254_v32 = vmul.f32 1.442695, %v241_v30  ;;  %366 = vst.msk [vmem:[#allocation6 + $0x10] sm:$0xff] %vm143_vm1, %v355_v31 }
  0xe3   :  { %497 = vpow2.f32 %v256_v29 }
  0xe4   :  { %499 = vpow2.f32 %v254_v32 }
  0xe5   :  { %v486_v33 = vpop.eup %485 }
  0xe6   :  { %v488_v34 = vpop.eup %487  ;;  %v132_v35 = vadd.f32 1.0, %v486_v33 }
  0xe7   :  { %v490_v36 = vpop.eup %489  ;;  %v134_v37 = vadd.f32 1.0, %v488_v34 }
  0xe8   :  { %v492_v38 = vpop.eup %491  ;;  %501 = vrcp.f32 %v132_v35  ;;  %v131_v39 = vadd.f32 1.0, %v490_v36 }
  0xe9   :  { %v494_v40 = vpop.eup %493  ;;  %503 = vrcp.f32 %v134_v37  ;;  %v133_v41 = vadd.f32 1.0, %v492_v38 }
  0xea   :  { %v496_v42 = vpop.eup %495  ;;  %505 = vrcp.f32 %v131_v39  ;;  %259 = vst.msk [vmem:[#allocation4 + $0x8] sm:$0xff] %vm143_vm1, %v494_v40 }
  0xeb   :  { %507 = vrcp.f32 %v133_v41  ;;  %258 = vst.msk [vmem:[#allocation4] sm:$0xff] %vm143_vm1, %v496_v42 }
  0xed   :  { %v498_v43 = vpop.eup %497 }
  0xee   :  { %v500_v44 = vpop.eup %499  ;;  %261 = vst.msk [vmem:[#allocation4 + $0x18] sm:$0xff] %vm143_vm1, %v498_v43 }
  0xef   :  { %260 = vst.msk [vmem:[#allocation4 + $0x10] sm:$0xff] %vm143_vm1, %v500_v44 }
  0xf0   :  { %520 = shalt.err (!%p517_p4)
}
  0xf1   :  { %s521_s22 = scalar_lea.hbm %s730_s3, 512 }
  0xf2   :  { %p522_p5 = scmp.ne.s32.totalorder %s730_s3, %s521_s22  ;;  %p525_p6 = scmp.lt.u32.totalorder %s521_s22, %s730_s3 }
  0xf4   :  { %p527_p7 = pnand %p525_p6, %p522_p5 }
  0xf6   :  { %530 = shalt.err (!%p527_p7)
}
  0xf7   :  { %s582_s26 = smov 128   ;;  %s583_s27 = smov 8  }
  0xf8   :  { %391 = dma.vmem_to_hbm [thread:$0]  %s386_s14, 512, %s730_s3, [#allocation5], %s582_s26, %s582_s26, %s583_s27  }
  0xf9   :  { %s531_s30 = scalar_lea.vmem %s667_s16, 512  ;;  %p536_p9 = scmp.lt.s32.totalorder %s667_s16, %s667_s16 }
  0xfa   :  { %p532_p8 = scmp.ne.s32.totalorder %s667_s16, %s531_s30  ;;  %p537_p10 = scmp.lt.s32.totalorder %s531_s30, %s531_s30 }
  0xfc   :  { %p538_p11 = por %p537_p10, %p536_p9 }
  0xfe   :  { %p539_p12 = pnand %p538_p11, %p532_p8 }
 0x100   :  { %542 = shalt.err (!%p539_p12)
}
 0x101   :  { %s543_s7 = scalar_lea.hbm %s731_s4, 512 }
 0x102   :  { %p544_p13 = scmp.ne.s32.totalorder %s731_s4, %s543_s7  ;;  %p547_p0 = scmp.lt.u32.totalorder %s543_s7, %s731_s4 }
 0x104   :  { %p549_p1 = pnand %p547_p0, %p544_p13 }
 0x106   :  { %552 = shalt.err (!%p549_p1)
}
 0x107   :  { %403 = dma.vmem_to_hbm [thread:$0]  %s667_s16, 512, %s731_s4, [#allocation5], %s582_s26, %s582_s26, %s583_s27   ;;  %v502_v45 = vpop.eup %501 }
 0x108   :  { %v504_v46 = vpop.eup %503  ;;  %145 = vst.msk [vmem:[#allocation2 + $0x8] sm:$0xff] %vm143_vm1, %v502_v45  ;;  %s553_s13 = scalar_lea.vmem %s374_s18, 512  ;;  %p558_p3 = scmp.lt.s32.totalorder %s374_s18, %s374_s18 }
 0x109   :  { %v506_v47 = vpop.eup %505  ;;  %147 = vst.msk [vmem:[#allocation2 + $0x18] sm:$0xff] %vm143_vm1, %v504_v46  ;;  %p554_p2 = scmp.ne.s32.totalorder %s374_s18, %s553_s13  ;;  %p559_p4 = scmp.lt.s32.totalorder %s553_s13, %s553_s13 }
 0x10a   :  { %v508_v48 = vpop.eup %507  ;;  %144 = vst.msk [vmem:[#allocation2] sm:$0xff] %vm143_vm1, %v506_v47 }
 0x10b   :  { %146 = vst.msk [vmem:[#allocation2 + $0x10] sm:$0xff] %vm143_vm1, %v508_v48  ;;  %p560_p5 = por %p559_p4, %p558_p3 }
 0x10d   :  { %p561_p6 = pnand %p560_p5, %p554_p2 }
 0x10f   :  { %564 = shalt.err (!%p561_p6)
}
 0x110   :  { %s565_s14 = scalar_lea.hbm %s729_s2, 512 }
 0x111   :  { %p566_p7 = scmp.ne.s32.totalorder %s729_s2, %s565_s14  ;;  %p569_p8 = scmp.lt.u32.totalorder %s565_s14, %s729_s2 }
 0x113   :  { %p571_p9 = pnand %p569_p8, %p566_p7 }
 0x115   :  { %574 = shalt.err (!%p571_p9)
}
 0x116   :  { %379 = dma.vmem_to_hbm [thread:$0]  %s374_s18, 512, %s729_s2, [#allocation3], %s582_s26, %s582_s26, %s583_s27  }
 0x117   :  { %575 = dma.done.wait [#allocation3], 512  }
 0x118   :  { %576 = vsyncadd [#allocation3], 4294966784 }
 0x119   :  { %577 = dma.done.wait [#allocation5], 1024  }
 0x11a   :  { %578 = vsyncadd [#allocation5], 4294966272 }
 0x11b   :  { %413 = vsyncpa [#allocation3], 1 }
 0x11c   :  { %414 = vsyncpa [#allocation5], 1 }

</bundles_post_ra>
